<compile_context>
chip_gen: v7x
topology: tpu7x:2x2x1
jax: 0.10.0
libtpu: 0.0.40
codegen_flags: <defaults>
</compile_context>

<pallas_src>
import functools

import jax
import jax.numpy as jnp
from jax import lax
from jax.experimental import pallas as pl
from jax.experimental.pallas import tpu as pltpu


# ----------------------------------------------------------------------------- Pallas kernel
def _fused_contrastive_kernel(h_p_ref, h_o_ref, w2_ref, out_ref, a_scratch, *,
                              bsz, temperature, base_temperature, adv_weight,
                              matmul_dtype, const_row_max):
    """Fused projection (h @ w2) + L2-norm for both views + ori_SupConLoss criterion.

    h_p_ref / h_o_ref : [bsz, hidden] VMEM hidden activations (perturbed view, original view).
    w2_ref            : [hidden, D]  VMEM projection weights.
    out_ref           : [1, 1]       VMEM scalar loss.
    a_scratch         : [M, D]       VMEM normalized view-major feature slab, M = 2*bsz.

    Assumptions that make the folded reduction exact (they hold for this module):
      * eye positive mask (labels=None, mask=None) -> exactly (n_views-1) positives per row,
      * PyTorch in-place aliasing of mix_square    -> LL block == adv_weight^2 * UR^T,
      * stop_grad=False, contrast_mode='all', n_views == 2.
    """
    n_views = 2
    M = bsz * n_views
    inv_t = 1.0 / temperature
    aw = adv_weight

    # ---- projection + L2 normalization (model_apply's tail), written view-major ----
    w2 = w2_ref[...].astype(matmul_dtype)
    for v, h_ref in enumerate((h_p_ref, h_o_ref)):          # static unroll, static slices
        f = lax.dot_general(h_ref[...].astype(matmul_dtype), w2,
                            (((1,), (0,)), ((), ())),
                            preferred_element_type=jnp.float32)              # [bsz, D]
        nrm = jnp.maximum(jnp.sqrt(jnp.sum(f * f, axis=-1, keepdims=True)), 1e-12)
        a_scratch[v * bsz:(v + 1) * bsz, :] = f / nrm

    # ---- anchor_dot_contrast = (A @ A.T) / T  (MXU, f32 accumulation) ----
    A = a_scratch[...].astype(matmul_dtype)
    s = lax.dot_general(A, A, (((1,), (1,)), ((), ())),
                        preferred_element_type=jnp.float32) * inv_t          # [M, M]

    # Broadcastable iotas (no full [M,M] int32 temporaries).
    row = lax.broadcasted_iota(jnp.int32, (M, 1), 0)
    col = lax.broadcasted_iota(jnp.int32, (1, M), 1)

    # ---- row-wise masked log-sum-exp ----
    if const_row_max:
        # Rows of A are unit-norm, so diag(s) == 1/T is the row max (Cauchy-Schwarz) and the
        # excluded self term is exactly exp(0) == 1.  Log-prob is shift-invariant, so this
        # matches the explicit-max reference bit-for-bit up to f32 rounding.
        c_row = inv_t + jnp.log(jnp.sum(jnp.exp(s - inv_t), axis=1, keepdims=True) - 1.0)
    else:
        # Generic path (used when matmul inputs are bf16 and the diagonal is no longer
        # exactly 1/T).
        off_diag = row != col
        row_max = jnp.max(s, axis=1, keepdims=True)
        e = jnp.where(off_diag, jnp.exp(s - row_max), 0.0)
        c_row = row_max + jnp.log(jnp.sum(e, axis=1, keepdims=True))          # [M, 1]

    # ---- single weighted reduction (replaces loss_square / mix_square block rewrites) ----
    #   ac = mix[0:B, B:]; mix[0:B, B:] = ac*aw; mix[B:, 0:B] = ac.T*aw   (ac is a view!)
    # => sum(mix) = sum(loss_sq) + (aw - 1 + aw^2) * sum_UR(loss_sq) - sum_LL(loss_sq)
    # => per-element weight: UR -> aw + aw^2, LL -> 0, diagonal blocks -> 1, non-pos -> 0.
    pos = (row == col + bsz) | (col == row + bsz)            # eye positives, n_views == 2
    in_ur = (row < bsz) & (col >= bsz)
    in_ll = (row >= bsz) & (col < bsz)
    w = jnp.where(pos,
                  jnp.where(in_ur, aw + aw * aw, jnp.where(in_ll, 0.0, 1.0)),
                  0.0)                                                        # [M, M]
    total = jnp.sum(jnp.sum((s - c_row) * w, axis=1, keepdims=True),
                    axis=0, keepdims=True)                                    # [1, 1]

    # With the eye mask every row has exactly (n_views-1) positives:
    #   loss = -(T/bT) * sum(mix) / (M * (n_views-1))
    scale = -(temperature / base_temperature) / (M * (n_views - 1))
    out_ref[...] = scale * total


def fused_contrastive_loss_pallas(h_p, h_o, w2, *, bsz, temperature,
                                  base_temperature, adv_weight,
                                  matmul_dtype=jnp.float32):
    """One pallas_call: projection + l2-norm of both views + ori_SupConLoss -> scalar loss.

    h_p, h_o: [bsz, hidden] hidden activations of the perturbed / original view.
    w2      : [hidden, D]   final projection weights.
    """
    B, hidden = h_p.shape
    assert B == bsz and h_o.shape == (B, hidden)
    hid2, D = w2.shape
    assert hid2 == hidden
    M = 2 * bsz

    # Constant-row-max shortcut is only exact-enough with f32 MXU inputs.
    const_row_max = jnp.dtype(matmul_dtype) == jnp.dtype(jnp.float32)

    kernel = functools.partial(
        _fused_contrastive_kernel, bsz=bsz, temperature=temperature,
        base_temperature=base_temperature, adv_weight=adv_weight,
        matmul_dtype=matmul_dtype, const_row_max=const_row_max)

    cost = pl.CostEstimate(
        flops=2 * (2 * B * hidden * D) + 2 * M * M * D + 16 * M * M,
        transcendentals=M * M + M,
        bytes_accessed=(2 * B * hidden + hidden * D) * 4 + 4)

    # No grid: single invocation, full arrays resident in VMEM (tiny).  For large bsz this
    # would become a row-tiled grid with "parallel" semantics + partial-sum outputs.
    out = pl.pallas_call(
        kernel,
        out_shape=jax.ShapeDtypeStruct((1, 1), jnp.float32),
        in_specs=[pl.BlockSpec(memory_space=pltpu.VMEM),
                  pl.BlockSpec(memory_space=pltpu.VMEM),
                  pl.BlockSpec(memory_space=pltpu.VMEM)],
        out_specs=pl.BlockSpec(memory_space=pltpu.VMEM),
        scratch_shapes=[pltpu.VMEM((M, D), jnp.float32)],
        cost_estimate=cost,
    )(h_p.astype(jnp.float32), h_o.astype(jnp.float32), w2.astype(jnp.float32))
    return out[0, 0]


# ----------------------------------------------------------------------------- plain-JAX glue
def ori_supcon_loss_ref(features, *, temperature, base_temperature, adv_weight):
    """Pure-JAX mirror of ori_SupConLoss (used for the attack gradient + sanity check)."""
    # TODO(synk): Pallas TPU kernels have no autodiff; the adversarial step differentiates
    # this mathematically-identical mirror instead of the kernel.
    B, V, D = features.shape
    M = B * V
    A = jnp.reshape(jnp.transpose(features, (1, 0, 2)), (M, D)).astype(jnp.float32)
    s = (A @ A.T) / temperature
    row = jnp.arange(M)[:, None]
    col = jnp.arange(M)[None, :]
    diag = row == col
    lm = jnp.where(diag, 0.0, 1.0)
    pos = jnp.where((row % B == col % B) & (~diag), 1.0, 0.0)
    mx = lax.stop_gradient(jnp.max(s, axis=1, keepdims=True))
    logits = s - mx
    el = jnp.exp(logits) * lm
    log_prob = logits - jnp.log(jnp.sum(el, axis=1, keepdims=True))
    ls = pos * log_prob
    in_ur = (row < B) & (col >= B)
    in_ll = (row >= B) & (col < B)
    mix = jnp.where(in_ur, ls * adv_weight,
                    jnp.where(in_ll, ls.T * (adv_weight * adv_weight), ls))
    mlpp = jnp.sum(mix, axis=1) / jnp.sum(pos, axis=1)
    loss = -(temperature / base_temperature) * mlpp
    return jnp.mean(loss)


def init_model_params(key, in_dim, hidden, proj_dim):
    k1, k2 = jax.random.split(key)
    w1 = 0.05 * jax.random.normal(k1, (in_dim, hidden), jnp.float32)
    w2 = 0.05 * jax.random.normal(k2, (hidden, proj_dim), jnp.float32)
    return w1, w2


def model_hidden(params, x):
    """Synthetic encoder trunk: flatten NCHW -> linear -> relu (projection head is fused)."""
    w1, _ = params
    B = x.shape[0]
    return jnp.maximum(jnp.reshape(x, (B, -1)) @ w1, 0.0)


def model_apply(params, x):
    """Full synthetic contrastive encoder (used only by the autodiff attack path / ref)."""
    _, w2 = params
    f = model_hidden(params, x) @ w2
    f = f / jnp.maximum(jnp.sqrt(jnp.sum(f * f, axis=-1, keepdims=True)), 1e-12)
    return f  # f_proj (use_self_features ignored by the synthetic model)


def contrastive_loss_forward(x, params, noise_key, *, epsilon, step_size,
                             temperature, base_temperature, adv_weight):
    """ContrastiveLoss.forward(x)  (attack='LinfAttack', images_t1=images_t2=None)."""
    # ---- get_max_for_contrastive: random start + exactly ONE Linf step (as in the source) ----
    x_cl = x + jax.random.uniform(noise_key, x.shape, x.dtype, -epsilon, epsilon)

    def attack_loss(xc):
        feats = jnp.stack([model_apply(params, xc), model_apply(params, x)], axis=1)
        return ori_supcon_loss_ref(feats, temperature=temperature,
                                   base_temperature=base_temperature,
                                   adv_weight=adv_weight)

    g = jax.grad(attack_loss)(x_cl)
    x_cl = x_cl + step_size * jnp.sign(g)
    eta = jnp.clip(x_cl - x, -epsilon, epsilon)
    x_new = jnp.clip(x + eta, 0.0, 1.0)

    # ---- compute_contrastive_loss: projection + norm + criterion fused in ONE pallas_call ----
    _, w2 = params
    h_p = model_hidden(params, x_new)                        # perturbed view trunk
    h_o = model_hidden(params, x)                            # original  view trunk
    loss = fused_contrastive_loss_pallas(h_p, h_o, w2, bsz=x.shape[0],
                                         temperature=temperature,
                                         base_temperature=base_temperature,
                                         adv_weight=adv_weight,
                                         matmul_dtype=jnp.float32)

    # Features recomputed in plain JAX purely for inspection / the reference check below;
    # the PyTorch forward only returns the loss.
    f_p = model_apply(params, x_new)
    f_o = model_apply(params, x)
    feats = jnp.stack([f_p, f_o], axis=1)                    # [B, 2, D]
    return loss, feats


if __name__ == "__main__":
    key = jax.random.PRNGKey(0)
    kx, kp, kn = jax.random.split(key, 3)

    # Small shapes: batch=8, NCHW images 4x16x16, hidden=64, projection dim=32, n_views=2.
    B, C, H, W = 8, 4, 16, 16
    hidden, proj_dim = 64, 32

    x = jax.random.uniform(kx, (B, C, H, W), jnp.float32)    # images in [0, 1]
    params = init_model_params(kp, C * H * W, hidden, proj_dim)

    # ContrastiveLoss(__init__) hyperparameters:
    #   attack='LinfAttack', epsilon=8/255, temp=0.5, num_steps=10 (only 1 runs), step_size=0.01
    #   loss_params = (tau_plus, beta, adv_weight, use_self_features) = (0.1, 1.0, 2.0, False)
    temperature = 0.5
    base_temperature = 0.07
    adv_weight = 2.0
    epsilon = 8.0 / 255.0
    step_size = 0.01

    loss, feats = contrastive_loss_forward(
        x, params, kn, epsilon=epsilon, step_size=step_size,
        temperature=temperature, base_temperature=base_temperature,
        adv_weight=adv_weight)
    loss = jax.block_until_ready(loss)

    # Sanity check: fused Pallas kernel vs pure-JAX criterion on the same features.
    ref = ori_supcon_loss_ref(feats, temperature=temperature,
                              base_temperature=base_temperature,
                              adv_weight=adv_weight)
    assert jnp.allclose(loss, ref, rtol=1e-3, atol=1e-3), (loss, ref)

    print("KERNEL_OK")
</pallas_src>

<mosaic_0001>
module attributes {stable_mosaic.version = 11 : i64} {
  func.func @_fused_contrastive_kernel(%arg0: memref<8x64xf32, #tpu.memory_space<vmem>>, %arg1: memref<8x64xf32, #tpu.memory_space<vmem>>, %arg2: memref<64x32xf32, #tpu.memory_space<vmem>>, %arg3: memref<1x1xf32, #tpu.memory_space<vmem>>, %arg4: memref<16x32xf32, #tpu.memory_space<vmem>>) attributes {dimension_semantics = [], scalar_prefetch = 0 : i64, scratch_operands = 1 : i64, tpu.core_type = #tpu.core_type<tc>} {
    %c0 = arith.constant 0 : index
    %c0_0 = arith.constant 0 : index
    %0 = vector.load %arg2[%c0, %c0_0] : memref<64x32xf32, #tpu.memory_space<vmem>>, vector<64x32xf32>
    %c0_1 = arith.constant 0 : index
    %c0_2 = arith.constant 0 : index
    %1 = vector.load %arg0[%c0_1, %c0_2] : memref<8x64xf32, #tpu.memory_space<vmem>>, vector<8x64xf32>
    %cst = arith.constant dense<0.000000e+00> : vector<8x32xf32>
    %2 = tpu.matmul %1, %0, %cst {dimension_numbers = #tpu.dot_dimension_numbers<[1], [0], [0], [1], [0, 0, 1, 1], [], []>} : vector<8x64xf32>, vector<64x32xf32>, vector<8x32xf32> -> vector<8x32xf32>
    %3 = arith.mulf %2, %2 : vector<8x32xf32>
    %cst_3 = arith.constant dense<0.000000e+00> : vector<8xf32>
    %4 = vector.multi_reduction <add>, %3, %cst_3 [1] : vector<8x32xf32> to vector<8xf32>
    %5 = vector.shape_cast %4 : vector<8xf32> to vector<8x1xf32>
    %6 = math.sqrt %5 : vector<8x1xf32>
    %cst_4 = arith.constant 9.99999996E-13 : f32
    %7 = vector.broadcast %cst_4 : f32 to vector<8x1xf32>
    %8 = arith.maximumf %6, %7 : vector<8x1xf32>
    %9 = vector.broadcast %8 : vector<8x1xf32> to vector<8x32xf32>
    %10 = arith.divf %2, %9 : vector<8x32xf32>
    %c0_5 = arith.constant 0 : index
    %c0_6 = arith.constant 0 : index
    %11 = vector.load %arg4[%c0_5, %c0_6] : memref<16x32xf32, #tpu.memory_space<vmem>>, vector<8x32xf32>
    tpu.vector_store %arg4[%c0_5, %c0_6], %10 {strides = array<i32>} : memref<16x32xf32, #tpu.memory_space<vmem>>, vector<8x32xf32>,
    %c0_7 = arith.constant 0 : index
    %c0_8 = arith.constant 0 : index
    %12 = vector.load %arg1[%c0_7, %c0_8] : memref<8x64xf32, #tpu.memory_space<vmem>>, vector<8x64xf32>
    %cst_9 = arith.constant dense<0.000000e+00> : vector<8x32xf32>
    %13 = tpu.matmul %12, %0, %cst_9 {dimension_numbers = #tpu.dot_dimension_numbers<[1], [0], [0], [1], [0, 0, 1, 1], [], []>} : vector<8x64xf32>, vector<64x32xf32>, vector<8x32xf32> -> vector<8x32xf32>
    %14 = arith.mulf %13, %13 : vector<8x32xf32>
    %cst_10 = arith.constant dense<0.000000e+00> : vector<8xf32>
    %15 = vector.multi_reduction <add>, %14, %cst_10 [1] : vector<8x32xf32> to vector<8xf32>
    %16 = vector.shape_cast %15 : vector<8xf32> to vector<8x1xf32>
    %17 = math.sqrt %16 : vector<8x1xf32>
    %cst_11 = arith.constant 9.99999996E-13 : f32
    %18 = vector.broadcast %cst_11 : f32 to vector<8x1xf32>
    %19 = arith.maximumf %17, %18 : vector<8x1xf32>
    %20 = vector.broadcast %19 : vector<8x1xf32> to vector<8x32xf32>
    %21 = arith.divf %13, %20 : vector<8x32xf32>
    %c8 = arith.constant 8 : index
    %c0_12 = arith.constant 0 : index
    %22 = vector.load %arg4[%c8, %c0_12] : memref<16x32xf32, #tpu.memory_space<vmem>>, vector<8x32xf32>
    tpu.vector_store %arg4[%c8, %c0_12], %21 {strides = array<i32>} : memref<16x32xf32, #tpu.memory_space<vmem>>, vector<8x32xf32>,
    %c0_13 = arith.constant 0 : index
    %c0_14 = arith.constant 0 : index
    %23 = vector.load %arg4[%c0_13, %c0_14] : memref<16x32xf32, #tpu.memory_space<vmem>>, vector<16x32xf32>
    %cst_15 = arith.constant dense<0.000000e+00> : vector<16x16xf32>
    %24 = tpu.matmul %23, %23, %cst_15 {dimension_numbers = #tpu.dot_dimension_numbers<[1], [1], [0], [0], [0, 0, 1, 0], [], []>} : vector<16x32xf32>, vector<16x32xf32>, vector<16x16xf32> -> vector<16x16xf32>
    %cst_16 = arith.constant 2.000000e+00 : f32
    %25 = vector.broadcast %cst_16 : f32 to vector<16x16xf32>
    %26 = arith.mulf %24, %25 : vector<16x16xf32>
    %27 = tpu.iota {dimensions = array<i32: 0>} : vector<16x1xi32>
    %28 = tpu.iota {dimensions = array<i32: 1>} : vector<1x16xi32>
    %cst_17 = arith.constant 2.000000e+00 : f32
    %29 = vector.broadcast %cst_17 : f32 to vector<16x16xf32>
    %30 = arith.subf %26, %29 : vector<16x16xf32>
    %31 = math.exp %30 : vector<16x16xf32>
    %cst_18 = arith.constant dense<0.000000e+00> : vector<16xf32>
    %32 = vector.multi_reduction <add>, %31, %cst_18 [1] : vector<16x16xf32> to vector<16xf32>
    %33 = vector.shape_cast %32 : vector<16xf32> to vector<16x1xf32>
    %cst_19 = arith.constant 1.000000e+00 : f32
    %34 = vector.broadcast %cst_19 : f32 to vector<16x1xf32>
    %35 = arith.subf %33, %34 : vector<16x1xf32>
    %36 = math.log %35 : vector<16x1xf32>
    %cst_20 = arith.constant 2.000000e+00 : f32
    %37 = vector.broadcast %cst_20 : f32 to vector<16x1xf32>
    %38 = arith.addf %37, %36 : vector<16x1xf32>
    %c8_i32 = arith.constant 8 : i32
    %39 = vector.broadcast %c8_i32 : i32 to vector<1x16xi32>
    %40 = arith.addi %28, %39 : vector<1x16xi32>
    %41 = vector.broadcast %27 : vector<16x1xi32> to vector<16x16xi32>
    %42 = vector.broadcast %40 : vector<1x16xi32> to vector<16x16xi32>
    %43 = arith.cmpi eq, %41, %42 : vector<16x16xi32>
    %c8_i32_21 = arith.constant 8 : i32
    %44 = vector.broadcast %c8_i32_21 : i32 to vector<16x1xi32>
    %45 = arith.addi %27, %44 : vector<16x1xi32>
    %46 = vector.broadcast %28 : vector<1x16xi32> to vector<16x16xi32>
    %47 = vector.broadcast %45 : vector<16x1xi32> to vector<16x16xi32>
    %48 = arith.cmpi eq, %46, %47 : vector<16x16xi32>
    %49 = arith.ori %43, %48 : vector<16x16xi1>
    %c8_i32_22 = arith.constant 8 : i32
    %50 = vector.broadcast %c8_i32_22 : i32 to vector<16x1xi32>
    %51 = arith.cmpi slt, %27, %50 : vector<16x1xi32>
    %c8_i32_23 = arith.constant 8 : i32
    %52 = vector.broadcast %c8_i32_23 : i32 to vector<1x16xi32>
    %53 = arith.cmpi sge, %28, %52 : vector<1x16xi32>
    %54 = vector.broadcast %51 : vector<16x1xi1> to vector<16x16xi1>
    %55 = vector.broadcast %53 : vector<1x16xi1> to vector<16x16xi1>
    %56 = arith.andi %54, %55 : vector<16x16xi1>
    %c8_i32_24 = arith.constant 8 : i32
    %57 = vector.broadcast %c8_i32_24 : i32 to vector<16x1xi32>
    %58 = arith.cmpi sge, %27, %57 : vector<16x1xi32>
    %c8_i32_25 = arith.constant 8 : i32
    %59 = vector.broadcast %c8_i32_25 : i32 to vector<1x16xi32>
    %60 = arith.cmpi slt, %28, %59 : vector<1x16xi32>
    %61 = vector.broadcast %58 : vector<16x1xi1> to vector<16x16xi1>
    %62 = vector.broadcast %60 : vector<1x16xi1> to vector<16x16xi1>
    %63 = arith.andi %61, %62 : vector<16x16xi1>
    %cst_26 = arith.constant 0.000000e+00 : f32
    %cst_27 = arith.constant 1.000000e+00 : f32
    %64 = vector.broadcast %cst_26 : f32 to vector<16x16xf32>
    %65 = vector.broadcast %cst_27 : f32 to vector<16x16xf32>
    %66 = arith.select %63, %64, %65 : vector<16x16xi1>, vector<16x16xf32>
    %cst_28 = arith.constant 6.000000e+00 : f32
    %67 = vector.broadcast %cst_28 : f32 to vector<16x16xf32>
    %68 = arith.select %56, %67, %66 : vector<16x16xi1>, vector<16x16xf32>
    %cst_29 = arith.constant 0.000000e+00 : f32
    %69 = vector.broadcast %cst_29 : f32 to vector<16x16xf32>
    %70 = arith.select %49, %68, %69 : vector<16x16xi1>, vector<16x16xf32>
    %71 = vector.broadcast %38 : vector<16x1xf32> to vector<16x16xf32>
    %72 = arith.subf %26, %71 : vector<16x16xf32>
    %73 = arith.mulf %72, %70 : vector<16x16xf32>
    %cst_30 = arith.constant dense<0.000000e+00> : vector<16xf32>
    %74 = vector.multi_reduction <add>, %73, %cst_30 [1] : vector<16x16xf32> to vector<16xf32>
    %75 = vector.shape_cast %74 : vector<16xf32> to vector<16x1xf32>
    %cst_31 = arith.constant dense<0.000000e+00> : vector<1xf32>
    %76 = vector.multi_reduction <add>, %75, %cst_31 [0] : vector<16x1xf32> to vector<1xf32>
    %77 = vector.shape_cast %76 : vector<1xf32> to vector<1x1xf32>
    %cst_32 = arith.constant -0.446428567 : f32
    %78 = vector.broadcast %cst_32 : f32 to vector<1x1xf32>
    %79 = arith.mulf %78, %77 : vector<1x1xf32>
    %c0_33 = arith.constant 0 : index
    %c0_34 = arith.constant 0 : index
    %80 = vector.load %arg3[%c0_33, %c0_34] : memref<1x1xf32, #tpu.memory_space<vmem>>, vector<1x1xf32>
    tpu.vector_store %arg3[%c0_33, %c0_34], %79 {strides = array<i32>} : memref<1x1xf32, #tpu.memory_space<vmem>>, vector<1x1xf32>,
    return
  }
}

</mosaic_0001>

<bundles_post_ra>
// kernel: tpu_custom_call.1
= control target key start
LH: loop header
LB: loop body
LE: loop exit
PB: predicated region body
PF: predicated region fallthrough
CT: control target
= control target key end

     0   :  { %v536_v3 = vmov 0.0|0.0   ;;  %vm537_vm0 = vmmov 0   ;;  %v538_v6 = vmov 0.0   ;;  %s615_s0 = inlined_call_operand.vmem [shape: f32[8,64], index: 0, kind: input, shape index: {}]   ;;  %s616_s1 = inlined_call_operand.vmem [shape: f32[8,64], index: 1, kind: input, shape index: {}]   ;;  %s617_s2 = inlined_call_operand.vmem [shape: f32[64,32], index: 2, kind: input, shape index: {}]   ;;  %s618_s3 = inlined_call_operand.hbm [shape: f32[1,1], index: 3, kind: output, shape index: {}]  }
   0x1   :  { %v15_v0 = vld [vmem:[%s617_s2] sm:$0xff]  ;;  %v16_v1 = vld [vmem:[%s617_s2 + $0x8] sm:$0xff]  ;;  %v17_v2 = vld [vmem:[%s617_s2 + $0x10] sm:$0xff]  ;;  %461 = vmatprep.subr.bf16.mxu0 %v536_v3  ;;  %473 = vmatprep.subr.bf16.mxu1 %v536_v3 }
   0x2   :  { %v462_v4 = vpack.c.bf16 %v16_v1, %v15_v0  ;;  %v18_v5 = vld [vmem:[%s617_s2 + $0x18] sm:$0xff]  ;;  %432 = vmatprep.mubr.msk.f32.mxu0 %vm537_vm0, %v538_v6  ;;  %451 = vmatprep.mubr.msk.f32.mxu1 %vm537_vm0, %v538_v6 }
   0x3   :  { %v465_v7 = vpack.c.bf16 %v18_v5, %v17_v2 }
   0x4   :  { %463 = vmatpush3.bf16.msra.mxu0 %v462_v4  ;;  %475 = vmatpush3.bf16.msra.mxu1 %v462_v4 }
   0x5   :  { %8 = vsyncpa [#allocation4], 0  ;;  %464 = vmatprep.subr.bf16.mxu0 %v536_v3  ;;  %476 = vmatprep.subr.bf16.mxu1 %v536_v3  ;;  %v19_v8 = vld [vmem:[%s617_s2 + $0x20] sm:$0xff]  ;;  %v20_v9 = vld [vmem:[%s617_s2 + $0x28] sm:$0xff]  ;;  %vm24_vm1 = vcmask 523264   ;;  %vm99_vm2 = vcmask 261120   ;;  %v288_v57 = vlaneseq }
   0x6   :  { %v468_v10 = vpack.c.bf16 %v20_v9, %v19_v8  ;;  %v21_v11 = vld [vmem:[%s617_s2 + $0x30] sm:$0xff]  ;;  %v22_v12 = vld [vmem:[%s617_s2 + $0x38] sm:$0xff]  ;;  %v23_v14 = vld [vmem:[%s615_s0] sm:$0xff]  ;;  %vm299_vm8 = vcmask 130048   ;;  %v539_v5 = vmov 1.0   ;;  %s540_s0 = smov [#allocation3]  }
   0x7   :  { %v471_v13 = vpack.c.bf16 %v22_v12, %v21_v11  ;;  %v114_v15 = vld [vmem:[%s616_s1] sm:$0xff]  ;;  %vm486_vm7 = vmpackc.low %vm99_vm2, %vm99_vm2  ;;  %v289_v60 = vshrl.u32 %v288_v57, 7  ;;  %v292_v0 = vand.u32 127, %v288_v57  ;;  %s376_s1 = sshll.u32 %s540_s0, 4  ;;  %vm368_vm15 = vcmask 0   ;;  %s377_s1 = int_to_ptr.vmem [resolvable:$true] %s376_s1 }
   0x8   :  { %466 = vmatpush3.bf16.msra.mxu0 %v465_v7  ;;  %478 = vmatpush3.bf16.msra.mxu1 %v465_v7  ;;  %s512_s2 = scalar_lea.vmem %s377_s1, 16  ;;  %s516_s5 = scalar_lea.vmem %s377_s1, 32 }
   0x9   :  { %467 = vmatprep.subr.bf16.mxu0 %v536_v3  ;;  %479 = vmatprep.subr.bf16.mxu1 %v536_v3  ;;  %v290_v63 = vadd.s32 8, %v289_v60  ;;  %vm324_vm9 = vcmp.ge.s32.totalorder %v292_v0, 8  ;;  %v314_v1 = vadd.s32 8, %v292_v0  ;;  %vm335_vm13 = vcmp.lt.s32.totalorder %v292_v0, 8  ;;  %p513_p0 = scmp.ne.s32.totalorder %s377_s1, %s512_s2  ;;  %p517_p1 = scmp.lt.s32.totalorder %s377_s1, %s377_s1 }
   0xa   :  { %v346_v6 = vsel %vm324_vm9, 6.0, %v539_v5  ;;  %v345_v12 = vsel %vm335_vm13, 0.0, %v539_v5  ;;  %p518_p2 = scmp.lt.s32.totalorder %s516_s5, %s512_s2 }
   0xb   :  { %v317_v2 = vadd.s32 8, %v290_v63  ;;  %vm318_vm10 = vcmp.eq.s32.totalorder %v292_v0, %v290_v63  ;;  %vm316_vm11 = vcmp.eq.s32.totalorder %v290_v63, %v314_v1 }
   0xc   :  { %469 = vmatpush3.bf16.msra.mxu0 %v468_v10  ;;  %481 = vmatpush3.bf16.msra.mxu1 %v468_v10  ;;  %v348_v9 = vsel %vm318_vm10, %v346_v6, 0.0  ;;  %p519_p3 = por %p518_p2, %p517_p1 }
   0xd   :  { %470 = vmatprep.subr.bf16.mxu0 %v536_v3  ;;  %482 = vmatprep.subr.bf16.mxu1 %v536_v3  ;;  %vm319_vm12 = vcmp.eq.s32.totalorder %v292_v0, %v317_v2 }
   0xe   :  { %vm321_vm14 = vmor %vm316_vm11, %vm319_vm12  ;;  %p520_p4 = pnand %p519_p3, %p513_p0 }
  0x10   :  { %472 = vmatpush3.bf16.msra.mxu0 %v471_v13  ;;  %484 = vmatpush3.bf16.msra.mxu1 %v471_v13 }
  0x13   :  { %433 = vmatmul.mubr.msk.f32.vlgmr.msra.gmra.mrb[0].mxu0 %vm24_vm1, %v23_v14  ;;  %452 = vmatmul.mubr.msk.f32.vlgmr.msra.gmra.mrb[0].mxu1 %vm24_vm1, %v114_v15  ;;  %v349_v15 = vsel %vm321_vm14, %v345_v12, 0.0 }
  0xe6   :  { %v94_v16 = vpop.f32.mrb[0].mxu0  ;;  %v184_v17 = vpop.f32.mrb[0].mxu1 }
  0xe7   :  { %v434_v18 = vpop.f32.mrb[1].mxu0  ;;  %v188_v19 = vmul.f32 %v184_v17, %v184_v17  ;;  %v453_v20 = vpop.f32.mrb[1].mxu1  ;;  %v98_v21 = vmul.f32 %v94_v16, %v94_v16 }
  0xe9   :  { %v100_v22 = vsel %vm99_vm2, %v98_v21, 0.0  ;;  %v189_v23 = vsel %vm99_vm2, %v188_v19, 0.0 }
  0xea   :  { %101 = vadd.xlane.f32.xlu0 %v100_v22 }
  0xee   :  { %190 = vadd.xlane.f32.xlu0 %v189_v23 }
 0x177   :  { %v102_v24 = vpop.xlane.xlu0 %101 }
 0x178   :  { %496 = vrsqrt.f32 %v102_v24  ;;  %vm105_vm3 = vcmp.eq.f32.partialorder %v102_v24, inf  ;;  %v108_v28 = vand.u32 2147483648, %v102_v24  ;;  %vm107_vm4 = vcmp.eq.f32.partialorder %v102_v24, 0.0 }
 0x17b   :  { %v191_v25 = vpop.xlane.xlu0 %190 }
 0x17c   :  { %498 = vrsqrt.f32 %v191_v25  ;;  %vm194_vm5 = vcmp.eq.f32.partialorder %v191_v25, inf  ;;  %v197_v34 = vand.u32 2147483648, %v191_v25  ;;  %vm196_vm6 = vcmp.eq.f32.partialorder %v191_v25, 0.0 }
 0x182   :  { %v497_v26 = vpop.eup %496 }
 0x183   :  { %v104_v27 = vmul.f32 %v497_v26, %v102_v24 }
 0x185   :  { %v106_v29 = vsel %vm105_vm3, %v102_v24, %v104_v27 }
 0x186   :  { %v499_v30 = vpop.eup %498  ;;  %v109_v31 = vsel %vm107_vm4, %v108_v28, %v106_v29 }
 0x187   :  { %v110_v32 = vmax.f32 %v109_v31, 1e-12  ;;  %v193_v33 = vmul.f32 %v499_v30, %v191_v25 }
 0x189   :  { %500 = vrcp.f32 %v110_v32  ;;  %v195_v35 = vsel %vm194_vm5, %v191_v25, %v193_v33 }
 0x18a   :  { %v198_v36 = vsel %vm196_vm6, %v197_v34, %v195_v35 }
 0x18b   :  { %v199_v37 = vmax.f32 %v198_v36, 1e-12 }
 0x18d   :  { %502 = vrcp.f32 %v199_v37 }
 0x193   :  { %v501_v38 = vpop.eup %500 }
 0x194   :  { %v112_v39 = vmul.f32 %v501_v38, %v94_v16 }
 0x196   :  { %113 = vst.msk [vmem:[#allocation2] sm:$0xff] %vm99_vm2, %v112_v39 }
 0x197   :  { %v503_v40 = vpop.eup %502 }
 0x198   :  { %v201_v41 = vmul.f32 %v503_v40, %v184_v17 }
 0x19a   :  { %202 = vst.msk [vmem:[#allocation2 + $0x8] sm:$0xff] %vm99_vm2, %v201_v41 }
 0x19d   :  { %v203_v42 = vld [vmem:[#allocation2] sm:$0xff] }
 0x19e   :  { %458 = vmatprep.mubr.msk.f32.mxu0 %vm99_vm2, %v203_v42 }
 0x1a1   :  { %v204_v43 = vld [vmem:[#allocation2 + $0x8] sm:$0xff] }
 0x1a2   :  { %v485_v44 = vpack.c.bf16 %v204_v43, %v203_v42 }
 0x1a4   :  { %487 = vmatprep.subr.msk.bf16.mxu0 %vm486_vm7, %v485_v44 }
 0x1a5   :  { %490 = vmatpush3.bf16.xpose.msk.msra.mxu0 %vm486_vm7, %v485_v44 }
 0x1ac   :  { %459 = vmatmul.mubr.msk.f32.vlgmr.msra.gmra.mrb[2].mxu0 %vm99_vm2, %v204_v43 }
 0x27f   :  { %v460_v45 = vpop.f32.mrb[2].mxu0 }
 0x280   :  { %v287_v46 = vmul.f32 2.0, %v460_v45  ;;  %v277_v47 = vpop.f32.mrb[3].mxu0 }
 0x281   :  { %v286_v48 = vmul.f32 2.0, %v277_v47 }
 0x282   :  { %v391_v49 = vadd.f32 -2.0, %v287_v46 }
 0x283   :  { %v390_v50 = vadd.f32 -2.0, %v286_v48 }
 0x284   :  { %v297_v51 = vmul.f32 1.442695, %v391_v49 }
 0x285   :  { %v295_v52 = vmul.f32 1.442695, %v390_v50 }
 0x287   :  { %504 = vpow2.f32 %v295_v52 }
 0x288   :  { %506 = vpow2.f32 %v297_v51 }
 0x291   :  { %v505_v53 = vpop.eup %504 }
 0x292   :  { %v300_v54 = vsel %vm299_vm8, %v505_v53, 0.0  ;;  %v507_v55 = vpop.eup %506 }
 0x293   :  { %301 = vadd.xlane.f32.xlu1 %v300_v54  ;;  %v303_v56 = vsel %vm299_vm8, %v507_v55, 0.0 }
 0x297   :  { %304 = vadd.xlane.f32.xlu1 %v303_v56 }
 0x320   :  { %v302_v58 = vpop.xlane.xlu1 %301 }
 0x321   :  { %v392_v59 = vadd.f32 -1.0, %v302_v58 }
 0x323   :  { %508 = vlog2.f32 %v392_v59 }
 0x324   :  { %v305_v61 = vpop.xlane.xlu1 %304 }
 0x325   :  { %v393_v62 = vadd.f32 -1.0, %v305_v61 }
 0x327   :  { %510 = vlog2.f32 %v393_v62 }
 0x32d   :  { %v509_v3 = vpop.eup %508 }
 0x32e   :  { %v309_v4 = vmul.f32 0.6931472, %v509_v3 }
 0x330   :  { %v312_v7 = vadd.f32 2.0, %v309_v4 }
 0x331   :  { %v511_v8 = vpop.eup %510 }
 0x332   :  { %v311_v10 = vmul.f32 0.6931472, %v511_v8  ;;  %v350_v11 = vsub.f32 %v286_v48, %v312_v7 }
 0x334   :  { %v313_v13 = vadd.f32 2.0, %v311_v10  ;;  %v352_v14 = vmul.f32 %v350_v11, %v348_v9 }
 0x336   :  { %v354_v16 = vsel %vm299_vm8, %v352_v14, 0.0  ;;  %v351_v17 = vsub.f32 %v287_v46, %v313_v13 }
 0x337   :  { %355 = vadd.xlane.f32.xlu0 %v354_v16 }
 0x338   :  { %v353_v18 = vmul.f32 %v351_v17, %v349_v15 }
 0x33a   :  { %v357_v19 = vsel %vm299_vm8, %v353_v18, 0.0 }
 0x33b   :  { %358 = vadd.xlane.f32.xlu1 %v357_v19 }
 0x3c4   :  { %v356_v20 = vpop.xlane.xlu0 %355 }
 0x3c8   :  { %v359_v21 = vpop.xlane.xlu1 %358 }
 0x3c9   :  { %v360_v22 = vadd.f32 %v359_v21, %v356_v20 }
 0x3cb   :  { %v361_v23 = vrot.slane %v360_v22, 4 }
 0x3cd   :  { %v362_v24 = vadd.f32 %v361_v23, %v360_v22 }
 0x3cf   :  { %v363_v25 = vrot.slane %v362_v24, 2 }
 0x3d1   :  { %v364_v26 = vadd.f32 %v363_v25, %v362_v24 }
 0x3d3   :  { %v365_v27 = vrot.slane %v364_v26, 1 }
 0x3d5   :  { %v366_v28 = vadd.f32 %v365_v27, %v364_v26 }
 0x3d7   :  { %v367_v29 = vmul.f32 -0.44642857, %v366_v28 }
 0x3d9   :  { %369 = vst.msk [vmem:[#allocation3] sm:$0x1] %vm368_vm15, %v367_v29 }
 0x3da   :  { %523 = shalt.err (!%p520_p4)
}
 0x3db   :  { %s524_s8 = scalar_lea.hbm %s618_s3, 16 }
 0x3dc   :  { %p525_p5 = scmp.ne.s32.totalorder %s618_s3, %s524_s8  ;;  %p528_p6 = scmp.lt.u32.totalorder %s524_s8, %s618_s3 }
 0x3de   :  { %p530_p7 = pnand %p528_p6, %p525_p5 }
 0x3e0   :  { %533 = shalt.err (!%p530_p7)
}
 0x3e1   :  { %379 = dma.vmem_to_hbm [thread:$0]  %s377_s1, 16, %s618_s3, [#allocation4]  }
 0x3e2   :  { %534 = dma.done.wait [#allocation4], 16  }
 0x3e3   :  { %535 = vsyncadd [#allocation4], 4294967280 }
 0x3e4   :  { %383 = vsyncpa [#allocation4], 1 }

</bundles_post_ra>
